<compile_context>
chip_gen: v7x
topology: tpu7x:2x2x1
jax: 0.10.0
libtpu: 0.0.40
codegen_flags: <defaults>
</compile_context>

<pallas_src>
import functools

import jax
import jax.numpy as jnp
from jax.experimental import pallas as pl
from jax.experimental.pallas import tpu as pltpu


def _round_up(a: int, b: int) -> int:
    return ((a + b - 1) // b) * b


def rmsnorm_kernel(x_ref, w_ref, o_ref, *, eps):
    # x_ref: (tile_rows, dim), w_ref: (1, dim), o_ref: (tile_rows, dim)
    x = x_ref[...]
    x_f32 = x.astype(jnp.float32)
    # mean of squares over the last (lane) dim, keepdims
    ms = jnp.mean(x_f32 * x_f32, axis=-1, keepdims=True)
    inv = jax.lax.rsqrt(ms + eps)
    # Match PyTorch exactly: _norm(x.float()).type_as(x) * weight
    normed = (x_f32 * inv).astype(x.dtype)
    o_ref[...] = (normed * w_ref[...]).astype(o_ref.dtype)


def rmsnorm(x, weight, eps: float = 1e-6, tile_rows: int | None = None,
            vmem_limit_bytes: int = 48 * 1024 * 1024):
    """x: (..., dim); weight: (dim,). Normalizes over the last dim."""
    orig_shape = x.shape
    dim = orig_shape[-1]
    rows = 1
    for s in orig_shape[:-1]:
        rows *= s

    itemsize = jnp.dtype(x.dtype).itemsize
    # Sublane packing: 8 rows per vreg for 32-bit, 16 for bf16, 32 for 8-bit.
    pack = max(8, 32 // itemsize)

    row_bytes = max(1, dim * itemsize)
    if tile_rows is None:
        target_block_bytes = 2 * 1024 * 1024   # ~roofline sweet spot
        max_block_bytes = 8 * 1024 * 1024      # 4x double-buffered <= 32 MiB
        tr = max(1, min(target_block_bytes // row_bytes,
                        max_block_bytes // row_bytes))
        tile_rows = max(pack, (tr // pack) * pack)
    else:
        tile_rows = max(pack, _round_up(tile_rows, pack))

    # Never exceed what the (padded) input actually needs.
    padded_rows_min = _round_up(rows, pack)
    tile_rows = min(tile_rows, padded_rows_min)

    # Prefer >= 2 grid steps (v7x megacore sharding) when rows permit.
    half = _round_up(-(-padded_rows_min // 2), pack)
    if padded_rows_min >= 2 * pack and tile_rows > half:
        tile_rows = half

    padded_rows = _round_up(rows, tile_rows)

    x2 = x.reshape(rows, dim)
    if padded_rows != rows:
        # Padded rows normalize zeros -> rsqrt(eps), finite; sliced off below.
        x2 = jnp.pad(x2, ((0, padded_rows - rows), (0, 0)))
    w2 = weight.reshape(1, dim)

    out_dtype = jnp.promote_types(x.dtype, weight.dtype)
    grid = (padded_rows // tile_rows,)

    # TODO(synk): for dim < 128 (e.g. the test's dim=32) a lane-dense layout
    # (folding several rows into the lane axis) would avoid masked vst on the
    # narrow last dim; kept the straightforward layout for robustness.
    out = pl.pallas_call(
        functools.partial(rmsnorm_kernel, eps=eps),
        out_shape=jax.ShapeDtypeStruct((padded_rows, dim), out_dtype),
        grid=grid,
        in_specs=[
            pl.BlockSpec((tile_rows, dim), lambda i: (i, 0)),
            pl.BlockSpec((1, dim), lambda i: (0, 0)),  # weight stays resident
        ],
        out_specs=pl.BlockSpec((tile_rows, dim), lambda i: (i, 0)),
        compiler_params=pltpu.CompilerParams(
            dimension_semantics=("parallel",),
            vmem_limit_bytes=vmem_limit_bytes,
        ),
    )(x2, w2)

    if padded_rows != rows:
        out = out[:rows]
    return out.reshape(orig_shape)


def rmsnorm_ref(x, weight, eps=1e-6):
    x_f32 = x.astype(jnp.float32)
    ms = jnp.mean(x_f32 * x_f32, axis=-1, keepdims=True)
    normed = (x_f32 * jax.lax.rsqrt(ms + eps)).astype(x.dtype)
    return normed * weight


if __name__ == "__main__":
    key = jax.random.PRNGKey(0)
    batch, seq, hidden = 2, 8, 32

    x = jax.random.normal(key, (batch, seq, hidden), dtype=jnp.float32)
    # nn.Parameter(torch.ones(dim)) — deterministic init of ones.
    weight = jnp.ones((hidden,), dtype=jnp.float32)

    out = rmsnorm(x, weight, eps=1e-6)
    out = jax.block_until_ready(out)

    ref = rmsnorm_ref(x, weight, eps=1e-6)
    assert out.shape == x.shape and out.dtype == x.dtype
    assert jnp.allclose(out, ref, atol=1e-5, rtol=1e-5), "mismatch vs reference"

    # Also exercise a non-divisible row count to cover the padded path.
    x_odd = jax.random.normal(jax.random.PRNGKey(1), (3, 5, hidden), jnp.float32)
    out_odd = jax.block_until_ready(rmsnorm(x_odd, weight))
    assert jnp.allclose(out_odd, rmsnorm_ref(x_odd, weight), atol=1e-5, rtol=1e-5)

    print("KERNEL_OK")
</pallas_src>

<mosaic_0001>
module attributes {stable_mosaic.version = 11 : i64} {
  func.func @rmsnorm_kernel(%arg0: i32, %arg1: memref<8x32xf32, #tpu.memory_space<vmem>>, %arg2: memref<1x32xf32, #tpu.memory_space<vmem>>, %arg3: memref<8x32xf32, #tpu.memory_space<vmem>>) attributes {dimension_semantics = [#tpu.dimension_semantics<parallel>], iteration_bounds = array<i64: 2>, scalar_prefetch = 0 : i64, scratch_operands = 0 : i64, tpu.core_type = #tpu.core_type<tc>, window_params = [{transform_indices = @transform_0, window_bounds = array<i64: 8, 32>}, {pipeline_mode = #tpu.pipeline_mode<synchronous>, transform_indices = @transform_1, window_bounds = array<i64: 1, 32>}, {transform_indices = @transform_2, window_bounds = array<i64: 8, 32>}]} {
    %c0 = arith.constant 0 : index
    %c0_0 = arith.constant 0 : index
    %0 = vector.load %arg1[%c0, %c0_0] : memref<8x32xf32, #tpu.memory_space<vmem>>, vector<8x32xf32>
    %1 = arith.mulf %0, %0 : vector<8x32xf32>
    %cst = arith.constant dense<0.000000e+00> : vector<8xf32>
    %2 = vector.multi_reduction <add>, %1, %cst [1] : vector<8x32xf32> to vector<8xf32>
    %3 = vector.shape_cast %2 : vector<8xf32> to vector<8x1xf32>
    %cst_1 = arith.constant 3.200000e+01 : f32
    %4 = vector.broadcast %cst_1 : f32 to vector<8x1xf32>
    %5 = arith.divf %3, %4 : vector<8x1xf32>
    %cst_2 = arith.constant 9.99999997E-7 : f32
    %6 = vector.broadcast %cst_2 : f32 to vector<8x1xf32>
    %7 = arith.addf %5, %6 : vector<8x1xf32>
    %8 = math.rsqrt %7 : vector<8x1xf32>
    %9 = vector.broadcast %8 : vector<8x1xf32> to vector<8x32xf32>
    %10 = arith.mulf %0, %9 : vector<8x32xf32>
    %c0_3 = arith.constant 0 : index
    %c0_4 = arith.constant 0 : index
    %11 = vector.load %arg2[%c0_3, %c0_4] : memref<1x32xf32, #tpu.memory_space<vmem>>, vector<1x32xf32>
    %12 = vector.broadcast %11 : vector<1x32xf32> to vector<8x32xf32>
    %13 = arith.mulf %10, %12 : vector<8x32xf32>
    %c0_5 = arith.constant 0 : index
    %c0_6 = arith.constant 0 : index
    %14 = vector.load %arg3[%c0_5, %c0_6] : memref<8x32xf32, #tpu.memory_space<vmem>>, vector<8x32xf32>
    tpu.vector_store %arg3[%c0_5, %c0_6], %13 {strides = array<i32>} : memref<8x32xf32, #tpu.memory_space<vmem>>, vector<8x32xf32>,
    return
  }
  func.func @transform_0(%arg0: i32) -> (i32, i32) {
    %c0_i32 = arith.constant 0 : i32
    %c0_i32_0 = arith.constant 0 : i32
    return %arg0, %c0_i32 : i32, i32
  }
  func.func @transform_1(%arg0: i32) -> (i32, i32) {
    %c0_i32 = arith.constant 0 : i32
    %c0_i32_0 = arith.constant 0 : i32
    %c0_i32_1 = arith.constant 0 : i32
    return %c0_i32, %c0_i32_0 : i32, i32
  }
  func.func @transform_2(%arg0: i32) -> (i32, i32) {
    %c0_i32 = arith.constant 0 : i32
    %c0_i32_0 = arith.constant 0 : i32
    return %arg0, %c0_i32 : i32, i32
  }
}

</mosaic_0001>

<bundles_post_ra>
// kernel: tpu_custom_call.1
= control target key start
LH: loop header
LB: loop body
LE: loop exit
PB: predicated region body
PF: predicated region fallthrough
CT: control target
= control target key end

     0   :  { %7 = vsyncpa [#allocation3], 0  ;;  %s605_s0 = inlined_call_operand.hbm [shape: f32[16,32], index: 0, kind: input, shape index: {}]   ;;  %s606_s1 = inlined_call_operand.vmem [shape: f32[1,32], index: 1, kind: input, shape index: {}]   ;;  %s607_s2 = inlined_call_operand.hbm [shape: f32[16,32], index: 2, kind: output, shape index: {}]  }
   0x1   :  { %9 = vsyncpa [#allocation3 + $0x1], 0 }
   0x2   :  { %10 = vsyncpa [#allocation4], 0 }
   0x3   :  { %12 = vsyncpa [#allocation4 + $0x1], 0  ;;  %s439_s9 = smov 0   ;;  %s441_s10 = smov 0  }
   0x4   :  { %s443_s11 = smov 0   ;;  %s445_s12 = smov 0  }
   0x5 LB: > { %s460_s13 = sadd.s32 4294967295, %s420_s12   ;;  %s263_s14 = sadd.s32 4294967294, %s420_s12   ;;  %s420_s12 = sphi %s445_s12, %s622_s12   ;;  %s416_s11 = sphi %s443_s11, %s621_s11   ;;  %s412_s10 = sphi %s441_s10, %s620_s10   ;;  %s408_s9 = sphi %s439_s9, %s619_s9  }
   0x6   : > { %s464_s15 = sadd.s32 1, %s420_s12   ;;  %s25_s16 = sadd.s32 1, %s416_s11 }
   0x7   : > { %s22_s17 = ssub.s32 %s420_s12, %s464_s15  ;;  %p32_p0 = scmp.ne.s32.totalorder %s416_s11, %s412_s10 }
   0x8   : > { %p23_p1 = scmp.eq.s32.totalorder %s22_s17, 0  ;;  %p33_p2 = scmp.eq.s32.totalorder %s420_s12, 0 }
   0x9   : > { %p38_p3 = scmp.ne.s32.totalorder %s412_s10, %s408_s9  ;;  %p39_p4 = scmp.eq.s32.totalorder %s460_s13, 0 }
   0xa   : > { %s476_s18 = scalar_select %p23_p1, %s416_s11, %s25_s16  }
   0xb   : > { %p478_p5 = por %p33_p2, %p32_p0  ;;  %p482_p6 = por %p39_p4, %p38_p3 }
   0xc   : > { %p83_p7 = scmp.eq.s32.totalorder %s460_s13, 1  ;;  %p89_p8 = scmp.eq.s32.totalorder %s263_s14, 1 }
   0xd   : > { %p288_p10 = scmp.lt.s32.totalorder %s420_s12, 2  ;;  %s112_s23 = sand.u32 1, %s416_s11  }
   0xe   : > { %p489_p11 = por %p83_p7, %p32_p0  ;;  %p493_p12 = por %p89_p8, %p38_p3 }
   0xf   : > { %s267_s24 = sshll.u32 %s420_s12, 7  ;;  %s266_s25 = sshll.u32 %s112_s23, 3 }
  0x10   : > { %s611_s21 = scalar_select %p489_p11, 1, 0 }
  0x11   : > { %s612_s22 = scalar_select %p493_p12, 1, 0 }
  0x12   : > { %s502_s28 = scalar_lea.hbm %s605_s0, %s267_s24  ;;  %s116_s29 = scalar_lea.vmem [#allocation2], %s266_s25 }
  0x13   : > { %s123_s30 = sshll.u32 %s116_s29, 4  ;;  %p506_p13 = pnand %p288_p10, %p478_p5  ;;  %s510_s30 = int_to_ptr.vmem [resolvable:$true] %s123_s30 }
  0x14   : > { %s113_s4 = scalar_lea.sflag [#allocation3], %s112_s23  ;;  %s324_s5 = scalar_lea.hbm %s502_s28, 128 }
  0x15   : > { %p325_p2 = scmp.ne.s32.totalorder %s502_s28, %s324_s5  ;;  %p326_p3 = pneg %p506_p13 }
  0x16   : > { %s329_s8 = scalar_lea.hbm %s605_s0, 256  ;;  %p330_p5 = scmp.lt.u32.totalorder %s502_s28, %s605_s0 }
  0x17   : > { %p327_p4 = pnand %p326_p3, %p325_p2  ;;  %p331_p8 = scmp.lt.u32.totalorder %s329_s8, %s324_s5 }
  0x18   : > { %p333_p9 = scmp.lt.u32.totalorder %s324_s5, %s502_s28 }
  0x19   : > { %p328_p7 = pneg %p327_p4  ;;  %p332_p10 = por %p331_p8, %p330_p5 }
  0x1b   : > { %p334_p0 = por %p333_p9, %p332_p10 }
  0x1d   : > { %p335_p1 = pnand %p334_p0, %p328_p7 }
  0x1f   : > { %338 = shalt.err (!%p335_p1)
}
  0x20   : > { %s339_s17 = scalar_lea.vmem %s510_s30, 128  ;;  %s422_s19 = smov [#allocation2]  }
  0x21   : > { %p340_p2 = scmp.ne.s32.totalorder %s510_s30, %s339_s17  ;;  %s344_s23 = sshll.u32 %s422_s19, 4  ;;  %s345_s23 = int_to_ptr.vmem [resolvable:$false] %s344_s23 }
  0x22   : > { %s346_s24 = scalar_lea.vmem %s345_s23, 256  ;;  %p347_p11 = scmp.lt.s32.totalorder %s510_s30, %s345_s23 }
  0x23   : > { %p342_p4 = pnand %p340_p2, %p326_p3  ;;  %p348_p5 = scmp.lt.s32.totalorder %s346_s24, %s339_s17 }
  0x25   : > { %p343_p12 = pneg %p342_p4  ;;  %p349_p8 = por %p348_p5, %p347_p11 }
  0x27   : > { %p350_p9 = pnand %p349_p8, %p343_p12 }
  0x29   : > { %353 = shalt.err (!%p350_p9)
}
  0x2a   : > { %283 = dma.hbm_to_vmem [thread:$0]  (!%p506_p13), %s502_s28, 128, %s510_s30, %s113_s4  }
  0x2b   : > { %p614_p0 = scmp.lt.s32.totalorder %s420_s12, 3  ;;  %p615_p1 = scmp.ge.s32.totalorder %s420_s12, 1 }
  0x2d   : > { %p129_p3 = pnand %p615_p1, %p614_p0 }
  0x2e   : > { %s544_s25 = sand.u32 (!%p129_p3), 1, %s412_s10  }
  0x2f   : > { %132 = sbr.rel (%p129_p3) target bundleno = 234 (0xea), region = 28  ;;  %s269_s26 = sshll.u32 (!%p129_p3), %s544_s25, 3 }
  0x30   : > { %s135_s27 = scalar_lea.sflag (!%p129_p3), [#allocation3], %s544_s25  ;;  %s138_s29 = scalar_lea.vmem (!%p129_p3), [#allocation2], %s269_s26 }
  0x36   : > { %399 = dma.done.wait (%p482_p6), %s135_s27, 128  }
  0x37   : > { %401 = vsyncadd (%p482_p6), %s135_s27, 4294967168  ;;  %v159_v0 = vld [vmem:[%s138_s29] sm:$0xff]  ;;  %vm161_vm0 = vcmask 261120   ;;  %s273_s20 = sshll.u32 %s460_s13, 7  ;;  %s158_s3 = scalar_lea.vmem [#allocation5], %s269_s26 }
  0x38   : > { %v160_v1 = vmul.f32 %v159_v0, %v159_v0  ;;  %v271_v7 = vld [vmem:[%s606_s1] ss:$0 sm:$0xff]  ;;  %s193_s4 = sshll.u32 %s158_s3, 4  ;;  %s560_s7 = scalar_lea.hbm %s607_s2, %s273_s20  ;;  %s562_s4 = int_to_ptr.vmem [resolvable:$true] %s193_s4 }
  0x39   : > { %s180_s8 = scalar_lea.sflag [#allocation4], %s544_s25  ;;  %s354_s14 = scalar_lea.vmem %s562_s4, 128 }
  0x3a   : > { %v162_v2 = vsel %vm161_vm0, %v160_v1, 0.0  ;;  %p355_p6 = scmp.ne.s32.totalorder %s562_s4, %s354_s14  ;;  %p616_p11 = scmp.ne.s32.totalorder %s611_s21, 0 }
  0x3b   : > { %163 = vadd.xlane.f32.xlu0 %v162_v2  ;;  %s423_s13 = smov [#allocation5]  }
  0x3c   : > { %p356_p12 = pnand %p355_p6, %p616_p11  ;;  %s358_s16 = sshll.u32 %s423_s13, 4  ;;  %s359_s16 = int_to_ptr.vmem [resolvable:$false] %s358_s16 }
  0x3d   : > { %s360_s17 = scalar_lea.vmem %s359_s16, 256  ;;  %p361_p7 = scmp.lt.s32.totalorder %s562_s4, %s359_s16 }
  0x3e   : > { %p357_p13 = pneg %p356_p12  ;;  %p362_p10 = scmp.lt.s32.totalorder %s360_s17, %s354_s14 }
  0x40   : > { %p363_p2 = por %p362_p10, %p361_p7 }
  0x42   : > { %p364_p4 = pnand %p363_p2, %p357_p13 }
  0xc8   : > { %v164_v3 = vpop.xlane.xlu0 %163 }
  0xc9   : > { %v166_v4 = vmul.f32 0.03125, %v164_v3 }
  0xcb   : > { %v167_v5 = vadd.f32 1e-06, %v166_v4 }
  0xcd   : > { %322 = vrsqrt.f32 %v167_v5 }
  0xd7   : > { %v323_v6 = vpop.eup %322 }
  0xd8   : > { %v169_v8 = vmul.f32 %v323_v6, %v159_v0 }
  0xda   : > { %v177_v9 = vmul.f32 %v271_v7, %v169_v8 }
  0xdc   : > { %178 = vst.msk [vmem:[%s158_s3] sm:$0xff] %vm161_vm0, %v177_v9 }
  0xdd   : > { %367 = shalt.err (!%p364_p4)
}
  0xde   : > { %s368_s19 = scalar_lea.hbm %s560_s7, 128  ;;  %s372_s25 = scalar_lea.hbm %s607_s2, 256 }
  0xdf   : > { %p369_p5 = scmp.ne.s32.totalorder %s560_s7, %s368_s19  ;;  %p373_p0 = scmp.lt.u32.totalorder %s560_s7, %s607_s2 }
  0xe0   : > { %p374_p1 = scmp.lt.u32.totalorder %s372_s25, %s368_s19  ;;  %p376_p6 = scmp.lt.u32.totalorder %s368_s19, %s560_s7 }
  0xe1   : > { %p370_p8 = pnand %p369_p5, %p616_p11 }
  0xe2   : > { %p375_p3 = por %p374_p1, %p373_p0 }
  0xe3   : > { %p371_p9 = pneg %p370_p8 }
  0xe4   : > { %p377_p12 = por %p376_p6, %p375_p3 }
  0xe6   : > { %p378_p13 = pnand %p377_p12, %p371_p9 }
  0xe8   : > { %381 = shalt.err (!%p378_p13)
}
  0xe9   : > { %278 = dma.vmem_to_hbm [thread:$0]  (%p616_p11), %s562_s4, 128, %s560_s7, %s180_s8  }
  0xea PF: > { %s205_s29 = sand.u32 1, %s408_s9   ;;  %p617_p7 = scmp.ne.s32.totalorder %s612_s22, 0 }
  0xeb   : > { %p618_p10 = scmp.ge.s32.totalorder %s420_s12, 2  ;;  %s206_s28 = scalar_lea.sflag [#allocation4], %s205_s29 }
  0xed   : > { %p285_p2 = pnand %p618_p10, %p617_p7 }
  0xef   : > { %403 = dma.done.wait (!%p285_p2), %s206_s28, 128  }
  0xf0   : > { %405 = vsyncadd (!%p285_p2), %s206_s28, 4294967168  ;;  %p15_p4 = scmp.ge.s32.totalorder %s464_s15, 4   ;;  %s619_s9 = smov %s412_s10 }
  0xf1   : > { %s620_s10 = smov %s416_s11  ;;  %s621_s11 = smov %s476_s18 }
  0xf2   : > { %s622_s12 = smov %s464_s15  ;;  %17 = sbr.rel (!%p15_p4) target bundleno = 5 (0x5), region = 73 }
  0xf9   :  { %211 = vsyncpa [#allocation3], 1 }
  0xfa   :  { %213 = vsyncpa [#allocation3 + $0x1], 1 }
  0xfb   :  { %214 = vsyncpa [#allocation4], 1 }
  0xfc   :  { %216 = vsyncpa [#allocation4 + $0x1], 1 }

</bundles_post_ra>
